<compile_context>
chip_gen: v5e
topology: v5e:2x2
jax: 0.10.0
libtpu: 0.0.40
codegen_flags: <defaults>
</compile_context>

<pallas_src>
import functools

import jax
import jax.numpy as jnp
from jax.experimental import pallas as pl
from jax.experimental.pallas import tpu as pltpu


def _hard_bootstrap_kernel(logits_ref, labels_ref, out_ref, *, beta, reduction,
                           n_rows, tile_n):
    # logits_ref: (tile_n, C) input dtype, VMEM ; labels_ref: (tile_n, 1) int32, VMEM
    logits = logits_ref[...].astype(jnp.float32)              # (T, C)
    labels = labels_ref[...]                                   # (T, 1) int32

    m = jnp.max(logits, axis=1, keepdims=True)                 # (T, 1)
    shifted = logits - m                                        # (T, C)
    col = jax.lax.broadcasted_iota(jnp.int32, shifted.shape, 1)
    # one VPU select instead of one-hot cast + multiply
    picked = jnp.where(col == labels, shifted, 0.0)             # (T, C)

    if reduction == "none":
        lse = jnp.log(jnp.sum(jnp.exp(shifted), axis=1))        # (T,)
        shifted_at_y = jnp.sum(picked, axis=1)                  # (T,)
        per_sample = lse - beta * shifted_at_y                   # (T,)
        # lane-dense store: one (1, tile_n) row per grid step
        out_ref[...] = per_sample.reshape(1, tile_n)
    else:
        i = pl.program_id(0)
        lse = jnp.log(jnp.sum(jnp.exp(shifted), axis=1, keepdims=True))   # (T, 1)
        shifted_at_y = jnp.sum(picked, axis=1, keepdims=True)             # (T, 1)
        per_sample = lse - beta * shifted_at_y                            # (T, 1)

        # mask rows that fall beyond the real batch in the (partial) last tile
        row = jax.lax.broadcasted_iota(jnp.int32, per_sample.shape, 0) + i * tile_n
        tile_sum = jnp.sum(jnp.where(row < n_rows, per_sample, 0.0))

        @pl.when(i == 0)
        def _init():
            out_ref[0, 0] = jnp.float32(0.0)

        out_ref[0, 0] += tile_sum

        if reduction == "mean":
            @pl.when(i == pl.num_programs(0) - 1)
            def _finalize():
                out_ref[0, 0] = out_ref[0, 0] / jnp.float32(n_rows)


def _choose_tile_n(c, itemsize):
    # ~2 MiB of f32 working set per (tile_n, C) row tile: double-buffered inputs plus the
    # in-kernel f32 temporaries stay well inside a 48 MiB scoped VMEM limit on v5e/v6e/v7x.
    del itemsize  # budget on the f32 working set (kernel upcasts internally)
    budget_rows = max(8, (2 * 1024 * 1024) // max(1, c * 4))
    if budget_rows >= 128:
        tile = min(32768, (budget_rows // 128) * 128)
    else:
        tile = max(8, (budget_rows // 8) * 8)
    return tile


def hard_bootstrapping_loss(y_pred, y, *, beta=0.8, reduction="mean", tile_n=None):
    """y_pred: (N, C) logits (f32 or bf16); y: (N,) int labels.

    Returns a scalar for reduction in ('mean', 'sum'), else the (N,) per-sample losses.
    """
    N, C = y_pred.shape
    labels2d = y.astype(jnp.int32).reshape(N, 1)

    if tile_n is None:
        tile_n = _choose_tile_n(C, jnp.dtype(y_pred.dtype).itemsize)
    if N <= tile_n:
        tile_n = N                      # single full block: no padded rows at all
    num_tiles = pl.cdiv(N, tile_n)

    kernel = functools.partial(_hard_bootstrap_kernel, beta=float(beta),
                               reduction=reduction, n_rows=N, tile_n=tile_n)

    in_specs = [
        pl.BlockSpec((tile_n, C), lambda i: (i, 0)),   # logits row tile (VMEM, pipelined)
        pl.BlockSpec((tile_n, 1), lambda i: (i, 0)),   # labels row tile (VMEM, pipelined)
    ]

    if reduction in ("mean", "sum"):
        out_shape = jax.ShapeDtypeStruct((1, 1), jnp.float32)
        out_specs = pl.BlockSpec(memory_space=pltpu.MemorySpace.SMEM)   # resident scalar acc
        dim_sem = ("arbitrary",)        # sequential accumulation across row tiles
    elif reduction == "none":
        out_shape = jax.ShapeDtypeStruct((num_tiles, tile_n), jnp.float32)
        out_specs = pl.BlockSpec((1, tile_n), lambda i: (i, 0))          # lane-dense rows
        dim_sem = ("parallel",)         # independent tiles -> both TCs on v7x
    else:
        raise ValueError(f"unsupported reduction: {reduction!r}")

    itemsize = jnp.dtype(y_pred.dtype).itemsize
    cost = pl.CostEstimate(
        flops=6 * N * C,
        transcendentals=N * C + N,
        bytes_accessed=N * C * itemsize + N * 4 + (N * 4 if reduction == "none" else 4),
    )

    result = pl.pallas_call(
        kernel,
        out_shape=out_shape,
        grid=(num_tiles,),
        in_specs=in_specs,
        out_specs=out_specs,
        compiler_params=pltpu.CompilerParams(
            dimension_semantics=dim_sem,
            vmem_limit_bytes=48 * 1024 * 1024,
        ),
        cost_estimate=cost,
    )(y_pred, labels2d)

    if reduction == "none":
        return result.reshape(num_tiles * tile_n)[:N]
    return result[0, 0]


def _reference(y_pred, y, beta=0.8, reduction="mean"):
    lsm = jax.nn.log_softmax(y_pred.astype(jnp.float32), axis=1)
    ce = -jnp.take_along_axis(lsm, y.reshape(-1, 1).astype(jnp.int32), axis=1)[:, 0]
    z = jnp.argmax(y_pred, axis=1)
    boot = -(1.0 - beta) * jnp.take_along_axis(lsm, z.reshape(-1, 1), axis=1)[:, 0]
    per = beta * ce + boot
    if reduction == "mean":
        return jnp.mean(per)
    if reduction == "sum":
        return jnp.sum(per)
    return per


if __name__ == "__main__":
    key = jax.random.PRNGKey(0)
    k1, k2, k3, k4 = jax.random.split(key, 4)

    # Small shape consistent with a classification head: batch=8, classes=16.
    N, C = 8, 16
    y_pred = jax.random.normal(k1, (N, C), dtype=jnp.float32)
    y = jax.random.randint(k2, (N,), 0, C, dtype=jnp.int32)

    for reduction in ("mean", "sum", "none"):
        out = jax.block_until_ready(
            hard_bootstrapping_loss(y_pred, y, beta=0.8, reduction=reduction))
        ref = _reference(y_pred, y, beta=0.8, reduction=reduction)
        assert jnp.allclose(out, ref, atol=1e-5, rtol=1e-5), (reduction, out, ref)

    # Larger batch exercising the tiled/pipelined path with a partial last tile (300 = 2*128 + 44).
    N2, C2 = 300, 16
    y_pred2 = jax.random.normal(k3, (N2, C2), dtype=jnp.float32)
    y2 = jax.random.randint(k4, (N2,), 0, C2, dtype=jnp.int32)
    for reduction in ("mean", "sum", "none"):
        out = jax.block_until_ready(
            hard_bootstrapping_loss(y_pred2, y2, beta=0.8, reduction=reduction, tile_n=128))
        ref = _reference(y_pred2, y2, beta=0.8, reduction=reduction)
        assert jnp.allclose(out, ref, atol=1e-4, rtol=1e-4), (reduction, out, ref)

    print("KERNEL_OK")
</pallas_src>

<mosaic_0001>
module attributes {stable_mosaic.version = 11 : i64} {
  func.func @_hard_bootstrap_kernel(%arg0: i32, %arg1: memref<8x16xf32, #tpu.memory_space<vmem>>, %arg2: memref<8x1xi32, #tpu.memory_space<vmem>>, %arg3: memref<1x1xf32, #tpu.memory_space<smem>>) attributes {dimension_semantics = [#tpu.dimension_semantics<arbitrary>], iteration_bounds = array<i64: 1>, scalar_prefetch = 0 : i64, scratch_operands = 0 : i64, tpu.core_type = #tpu.core_type<tc>, window_params = [{transform_indices = @transform_0, window_bounds = array<i64: 8, 16>}, {transform_indices = @transform_1, window_bounds = array<i64: 8, 1>}, {transform_indices = @transform_2, window_bounds = array<i64: 1, 1>}]} {
    %c0 = arith.constant 0 : index
    %c0_0 = arith.constant 0 : index
    %0 = vector.load %arg1[%c0, %c0_0] : memref<8x16xf32, #tpu.memory_space<vmem>>, vector<8x16xf32>
    %c0_1 = arith.constant 0 : index
    %c0_2 = arith.constant 0 : index
    %1 = vector.load %arg2[%c0_1, %c0_2] : memref<8x1xi32, #tpu.memory_space<vmem>>, vector<8x1xi32>
    %cst = arith.constant dense<0xFF800000> : vector<8xf32>
    %2 = vector.multi_reduction <maximumf>, %0, %cst [1] : vector<8x16xf32> to vector<8xf32>
    %3 = vector.shape_cast %2 : vector<8xf32> to vector<8x1xf32>
    %4 = vector.broadcast %3 : vector<8x1xf32> to vector<8x16xf32>
    %5 = arith.subf %0, %4 : vector<8x16xf32>
    %6 = tpu.iota {dimensions = array<i32: 1>} : vector<8x16xi32>
    %7 = vector.broadcast %1 : vector<8x1xi32> to vector<8x16xi32>
    %8 = arith.cmpi eq, %6, %7 : vector<8x16xi32>
    %cst_3 = arith.constant 0.000000e+00 : f32
    %9 = vector.broadcast %cst_3 : f32 to vector<8x16xf32>
    %10 = arith.select %8, %5, %9 : vector<8x16xi1>, vector<8x16xf32>
    %11 = math.exp %5 : vector<8x16xf32>
    %cst_4 = arith.constant dense<0.000000e+00> : vector<8xf32>
    %12 = vector.multi_reduction <add>, %11, %cst_4 [1] : vector<8x16xf32> to vector<8xf32>
    %13 = vector.shape_cast %12 : vector<8xf32> to vector<8x1xf32>
    %14 = math.log %13 : vector<8x1xf32>
    %cst_5 = arith.constant dense<0.000000e+00> : vector<8xf32>
    %15 = vector.multi_reduction <add>, %10, %cst_5 [1] : vector<8x16xf32> to vector<8xf32>
    %16 = vector.shape_cast %15 : vector<8xf32> to vector<8x1xf32>
    %cst_6 = arith.constant 8.000000e-01 : f32
    %17 = vector.broadcast %cst_6 : f32 to vector<8x1xf32>
    %18 = arith.mulf %17, %16 : vector<8x1xf32>
    %19 = arith.subf %14, %18 : vector<8x1xf32>
    %20 = tpu.iota {dimensions = array<i32: 0>} : vector<8x1xi32>
    %c8_i32 = arith.constant 8 : i32
    %21 = arith.muli %arg0, %c8_i32 : i32
    %22 = vector.broadcast %21 : i32 to vector<8x1xi32>
    %23 = arith.addi %20, %22 : vector<8x1xi32>
    %c8_i32_7 = arith.constant 8 : i32
    %24 = vector.broadcast %c8_i32_7 : i32 to vector<8x1xi32>
    %25 = arith.cmpi slt, %23, %24 : vector<8x1xi32>
    %cst_8 = arith.constant 0.000000e+00 : f32
    %26 = vector.broadcast %cst_8 : f32 to vector<8x1xf32>
    %27 = arith.select %25, %19, %26 : vector<8x1xi1>, vector<8x1xf32>
    %28 = vector.shape_cast %27 : vector<8x1xf32> to vector<1x8x1xf32>
    %cst_9 = arith.constant dense<0.000000e+00> : vector<1xf32>
    %29 = vector.multi_reduction <add>, %28, %cst_9 [1, 2] : vector<1x8x1xf32> to vector<1xf32>
    %30 = vector.shape_cast %29 : vector<1xf32> to vector<1x1x1xf32>
    %31 = vector.extract %30[0, 0, 0] : f32 from vector<1x1x1xf32>
    %c0_i32 = arith.constant 0 : i32
    %32 = arith.cmpi eq, %arg0, %c0_i32 : i32
    %33 = arith.extui %32 : i1 to i32
    %c0_i32_10 = arith.constant 0 : i32
    %34 = arith.cmpi ne, %33, %c0_i32_10 : i32
    scf.if %34 {
      %cst_17 = arith.constant 0.000000e+00 : f32
      %c0_18 = arith.constant 0 : index
      %c0_19 = arith.constant 0 : index
      %41 = memref.load %arg3[%c0_18, %c0_19] : memref<1x1xf32, #tpu.memory_space<smem>>
      memref.store %cst_17, %arg3[%c0_18, %c0_19] : memref<1x1xf32, #tpu.memory_space<smem>>
    } else {
    }
    %c0_11 = arith.constant 0 : index
    %c0_12 = arith.constant 0 : index
    %35 = memref.load %arg3[%c0_11, %c0_12] : memref<1x1xf32, #tpu.memory_space<smem>>
    %36 = arith.addf %35, %31 : f32
    %c0_13 = arith.constant 0 : index
    %c0_14 = arith.constant 0 : index
    %37 = memref.load %arg3[%c0_13, %c0_14] : memref<1x1xf32, #tpu.memory_space<smem>>
    memref.store %36, %arg3[%c0_13, %c0_14] : memref<1x1xf32, #tpu.memory_space<smem>>
    %c0_i32_15 = arith.constant 0 : i32
    %38 = arith.cmpi eq, %arg0, %c0_i32_15 : i32
    %39 = arith.extui %38 : i1 to i32
    %c0_i32_16 = arith.constant 0 : i32
    %40 = arith.cmpi ne, %39, %c0_i32_16 : i32
    scf.if %40 {
      %c0_17 = arith.constant 0 : index
      %c0_18 = arith.constant 0 : index
      %41 = memref.load %arg3[%c0_17, %c0_18] : memref<1x1xf32, #tpu.memory_space<smem>>
      %cst_19 = arith.constant 8.000000e+00 : f32
      %42 = arith.divf %41, %cst_19 : f32
      %c0_20 = arith.constant 0 : index
      %c0_21 = arith.constant 0 : index
      %43 = memref.load %arg3[%c0_20, %c0_21] : memref<1x1xf32, #tpu.memory_space<smem>>
      memref.store %42, %arg3[%c0_20, %c0_21] : memref<1x1xf32, #tpu.memory_space<smem>>
    } else {
    }
    return
  }
  func.func @transform_0(%arg0: i32) -> (i32, i32) {
    %c0_i32 = arith.constant 0 : i32
    %c0_i32_0 = arith.constant 0 : i32
    return %arg0, %c0_i32 : i32, i32
  }
  func.func @transform_1(%arg0: i32) -> (i32, i32) {
    %c0_i32 = arith.constant 0 : i32
    %c0_i32_0 = arith.constant 0 : i32
    return %arg0, %c0_i32 : i32, i32
  }
  func.func @transform_2(%arg0: i32) -> (i32, i32) {
    %c0_i32 = arith.constant 0 : i32
    %c0_i32_0 = arith.constant 0 : i32
    %c0_i32_1 = arith.constant 0 : i32
    return %c0_i32, %c0_i32_0 : i32, i32
  }
}

</mosaic_0001>

<bundles_post_ra>
// kernel: tpu_custom_call.1
= control target key start
LH: loop header
LB: loop body
LE: loop exit
PB: predicated region body
PF: predicated region fallthrough
CT: control target
= control target key end

     0   :  { %vm14_vm0 = vcmask 130048   ;;  %s154_s0 = inlined_call_operand.vmem [shape: f32[8,16], index: 0, kind: input, shape index: {}]   ;;  %s155_s1 = inlined_call_operand.vmem [shape: s32[8,1], index: 1, kind: input, shape index: {}]   ;;  %s156_s2 = inlined_call_operand.hbm [shape: f32[1,1], index: 2, kind: output, shape index: {}]  }
   0x1   :  { %v12_v0 = vld [vmem:[%s154_s0] sm:$0xff] }
   0x2   :  { %7 = vsyncpa [#allocation3], 0  ;;  %v15_v1 = vsel %vm14_vm0, %v12_v0, -inf  ;;  %v124_v2 = vmov 0   ;;  %v13_v3 = vld [vmem:[%s155_s1] sm:$0xff]  ;;  %v19_v9 = vlaneseq  ;;  %vm45_vm2 = vcmask 7168  }
   0x3   :  { %103 = vset.pattern.permute.xlu0 %v124_v2  ;;  %v125_v21 = vmov 8.0   ;;  %s85_s13 = sshll.u32 %s156_s2, 4  ;;  %s126_s17 = smov [#allocation2]   ;;  %s86_s13 = int_to_ptr.hbm [resolvable:$true] %s85_s13 }
   0x4   :  { %16 = vmax.xlane.f32.xlu0 %v15_v1  ;;  %v20_v10 = vand.u32 127, %v19_v9 }
  0x18   :  { %22 = vperm.xlu0 %103, %v13_v3  }
  0x77   :  { %v17_v4 = vpop.xlane.xlu0 %16 }
  0x78   :  { %v18_v5 = vsub.f32 %v12_v0, %v17_v4 }
  0x7a   :  { %v26_v6 = vmul.f32 1.442695, %v18_v5 }
  0x7c   :  { %104 = vpow2.f32 %v26_v6 }
  0x82   :  { %v105_v7 = vpop.eup %104 }
  0x83   :  { %v28_v8 = vsel %vm14_vm0, %v105_v7, 0.0 }
  0x84   :  { %29 = vadd.xlane.f32.xlu1 %v28_v8 }
  0x8a   :  { %v23_v11 = vpop.permute.xlu0 %22 }
  0x8b   :  { %vm24_vm1 = vcmp.eq.s32.totalorder %v20_v10, %v23_v11 }
  0x8c   :  { %v25_v12 = vsel %vm24_vm1, %v18_v5, 0.0 }
  0x8d   :  { %v33_v13 = vsel %vm14_vm0, %v25_v12, 0.0 }
  0x8e   :  { %34 = vadd.xlane.f32.xlu1 %v33_v13 }
  0xf7   :  { %v30_v14 = vpop.xlane.xlu1 %29 }
  0xf8   :  { %106 = vlog2.f32 %v30_v14 }
  0xf9   :  { %108 = vrcp.f32 %v125_v21 }
  0xfe   :  { %v107_v15 = vpop.eup %106 }
  0xff   :  { %v32_v17 = vmul.f32 0.6931472, %v107_v15  ;;  %v109_v22 = vpop.eup %108 }
 0x100   :  { %v71_v23 = vmul.f32 8.0, %v109_v22  ;;  %vm75_vm3 = vweird.f32 %v109_v22 }
 0x101   :  { %v35_v16 = vpop.xlane.xlu1 %34 }
 0x102   :  { %v36_v18 = vmul.f32 0.8, %v35_v16  ;;  %v72_v24 = vsub.f32 1.0, %v71_v23 }
 0x104   :  { %v37_v19 = vsub.f32 %v32_v17, %v36_v18  ;;  %v73_v28 = vmul.f32 %v109_v22, %v72_v24 }
 0x106   :  { %v46_v20 = vsel %vm45_vm2, %v37_v19, 0.0  ;;  %v74_v31 = vadd.f32 %v109_v22, %v73_v28 }
 0x107   :  { %47 = vadd.xlane.f32.xlu2 %v46_v20 }
 0x108   :  { %v76_v34 = vsel %vm75_vm3, %v109_v22, %v74_v31 }
 0x17a   :  { %v48_v25 = vpop.xlane.xlu2 %47 }
 0x17b   :  { %v49_v26 = vrot.slane %v48_v25, 4 }
 0x17d   :  { %v50_v27 = vadd.f32 %v49_v26, %v48_v25 }
 0x17f   :  { %v51_v29 = vrot.slane %v50_v27, 2 }
 0x181   :  { %v52_v30 = vadd.f32 %v51_v29, %v50_v27 }
 0x183   :  { %v53_v32 = vrot.slane %v52_v30, 1 }
 0x185   :  { %v54_v33 = vadd.f32 %v53_v32, %v52_v30 }
 0x187   :  { %95 = vpush %v54_v33 }
 0x188   :  { %97 = vpush %v76_v34 }
 0x1b8   :  { %s96_s14 = spop %95 }
 0x1b9   :  { %s98_s15 = spop %97 }
 0x1ba   :  { %s78_s16 = smul.f32 %s98_s15, %s96_s14 }
 0x1bc   :  { %79 = sst [smem:[#allocation2]] %s78_s16 }
 0x1bd   :  { %88 = dma.smem_to_hbm %s126_s17, 16, %s86_s13, [#allocation3]  }
 0x1be   :  { %122 = dma.done.wait [#allocation3], 16  }
 0x1bf   :  { %123 = vsyncadd [#allocation3], 4294967280 }
 0x1c0   :  { %93 = sfence }
 0x1c1   :  { %94 = vsyncpa [#allocation3], 1 }

</bundles_post_ra>
